<compile_context>
chip_gen: v5e
topology: v5e:2x2
jax: 0.10.0
libtpu: 0.0.40
codegen_flags: <defaults>
</compile_context>

<pallas_src>
import jax
import jax.numpy as jnp
from jax import lax
from jax.experimental import pallas as pl
from jax.experimental.pallas import tpu as pltpu


def mlp_kernel(x_ref, w1_ref, b1_ref, w2_ref, b2_ref, w3_ref, b3_ref, ot_ref):
    # x_ref: [tb, F] batch tile, natural layout.
    # Layer 1: contract the feature axis of both operands ("nt" matmul):
    #   h1^T = W1 @ x_tile^T  ->  [64, tb]  (batch lands on the lane axis).
    h1 = lax.dot_general(
        w1_ref[...], x_ref[...],
        dimension_numbers=(((1,), (1,)), ((), ())),
        preferred_element_type=jnp.float32,
    )
    h1 = jnp.maximum(h1 + b1_ref[...], 0.0)                             # ReLU
    # Dropout(0.2): identity at inference time.
    h2 = jnp.dot(w2_ref[...], h1, preferred_element_type=jnp.float32)   # [32, tb]
    h2 = jnp.maximum(h2 + b2_ref[...], 0.0)                             # ReLU
    # Dropout(0.2): identity at inference time.
    out = jnp.dot(w3_ref[...], h2, preferred_element_type=jnp.float32)  # [1, tb]
    ot_ref[...] = (out + b3_ref[...]).astype(ot_ref.dtype)


def _choose_batch_tile(B, batch_tile):
    # Small batches: one block covering the full batch (block == full array
    # dim, so no (8,128) alignment requirement applies).
    if B <= 256:
        return B
    # Tiles along the batch axis must be multiples of 128 (lane axis for the
    # output, sublane axis for the input -- 128 satisfies both).
    tb = min(batch_tile, B)
    tb = max(128, (tb // 128) * 128)
    # Keep at least 2 grid steps so the batch axis can shard across v7x's two
    # TensorCores (harmless on single-core v5e/v6e).
    while tb > 128 and pl.cdiv(B, tb) < 2:
        tb -= 128
    return tb


def bitcoin_return_predictor(x, params, *, batch_tile=2048):
    """x: [B, input_size] float32. params: PyTorch-layout weights/biases.

    w*: [out_features, in_features], b*: [out_features, 1].
    Returns [B, 1] float32.
    """
    w1, b1, w2, b2, w3, b3 = (
        params["w1"], params["b1"], params["w2"],
        params["b2"], params["w3"], params["b3"],
    )
    B, F = x.shape
    H1 = w1.shape[0]   # 64
    H2 = w2.shape[0]   # 32
    O = w3.shape[0]    # 1

    tb = _choose_batch_tile(B, batch_tile)
    grid = (pl.cdiv(B, tb),)

    # Weights / biases are tiny: one full block each, replicated across the
    # batch grid (constant block index => fetched once).
    full = lambda shape: pl.BlockSpec(shape, lambda i: (0,) * len(shape))

    flops = 2 * B * (F * H1 + H1 * H2 + H2 * O)
    bytes_accessed = 4 * (
        B * F + B * O + F * H1 + H1 + H1 * H2 + H2 + H2 * O + O
    )
    cost = pl.CostEstimate(
        flops=flops, transcendentals=0, bytes_accessed=bytes_accessed
    )

    out_t = pl.pallas_call(
        mlp_kernel,
        out_shape=jax.ShapeDtypeStruct((O, B), jnp.float32),
        grid_spec=pltpu.PrefetchScalarGridSpec(
            num_scalar_prefetch=0,
            grid=grid,
            in_specs=[
                pl.BlockSpec((tb, F), lambda i: (i, 0)),   # x batch tile (natural layout)
                full((H1, F)), full((H1, 1)),              # layer 1
                full((H2, H1)), full((H2, 1)),             # layer 2
                full((O, H2)), full((O, 1)),               # layer 3
            ],
            out_specs=pl.BlockSpec((O, tb), lambda i: (0, i)),  # lane-dense output
        ),
        compiler_params=pltpu.CompilerParams(
            dimension_semantics=("parallel",)
        ),
        cost_estimate=cost,
    )(x, w1, b1, w2, b2, w3, b3)

    return out_t.T                               # [B, O] (contiguity-preserving)


def init_params(key, input_size):
    """Deterministic init in PyTorch nn.Linear layout: W [out, in], b [out, 1]."""
    ks = jax.random.split(key, 6)

    def lin(kw, kb, fan_in, fan_out):
        bound = 1.0 / jnp.sqrt(fan_in)
        w = jax.random.uniform(kw, (fan_out, fan_in), jnp.float32, -bound, bound)
        b = jax.random.uniform(kb, (fan_out, 1), jnp.float32, -bound, bound)
        return w, b

    w1, b1 = lin(ks[0], ks[1], input_size, 64)
    w2, b2 = lin(ks[2], ks[3], 64, 32)
    w3, b3 = lin(ks[4], ks[5], 32, 1)
    return {"w1": w1, "b1": b1, "w2": w2, "b2": b2, "w3": w3, "b3": b3}


def reference_forward(x, p):
    h1 = jnp.maximum(x @ p["w1"].T + p["b1"][:, 0], 0.0)
    h2 = jnp.maximum(h1 @ p["w2"].T + p["b2"][:, 0], 0.0)
    return h2 @ p["w3"].T + p["b3"][:, 0]


if __name__ == "__main__":
    key = jax.random.PRNGKey(0)
    k_x, k_x2, k_p = jax.random.split(key, 3)

    input_size = 32
    params = init_params(k_p, input_size)

    # Small-shape check (single grid step, block == full batch).
    batch = 8
    x = jax.random.normal(k_x, (batch, input_size), jnp.float32)
    out = jax.block_until_ready(bitcoin_return_predictor(x, params))
    ref = reference_forward(x, params)
    assert out.shape == (batch, 1)
    assert jnp.allclose(out, ref, atol=1e-5, rtol=1e-5), "mismatch vs reference"

    # Multi-step grid check (128-aligned batch tiling + partial last block).
    batch2 = 384
    x2 = jax.random.normal(k_x2, (batch2, input_size), jnp.float32)
    out2 = jax.block_until_ready(bitcoin_return_predictor(x2, params))
    ref2 = reference_forward(x2, params)
    assert out2.shape == (batch2, 1)
    assert jnp.allclose(out2, ref2, atol=1e-5, rtol=1e-5), "mismatch vs reference (tiled)"

    print("KERNEL_OK")
</pallas_src>

<mosaic_0001>
module attributes {stable_mosaic.version = 11 : i64} {
  func.func @mlp_kernel(%arg0: i32, %arg1: memref<8x32xf32, #tpu.memory_space<vmem>>, %arg2: memref<64x32xf32, #tpu.memory_space<vmem>>, %arg3: memref<64x1xf32, #tpu.memory_space<vmem>>, %arg4: memref<32x64xf32, #tpu.memory_space<vmem>>, %arg5: memref<32x1xf32, #tpu.memory_space<vmem>>, %arg6: memref<1x32xf32, #tpu.memory_space<vmem>>, %arg7: memref<1x1xf32, #tpu.memory_space<vmem>>, %arg8: memref<1x8xf32, #tpu.memory_space<vmem>>) attributes {dimension_semantics = [#tpu.dimension_semantics<parallel>], iteration_bounds = array<i64: 1>, scalar_prefetch = 0 : i64, scratch_operands = 0 : i64, tpu.core_type = #tpu.core_type<tc>, window_params = [{transform_indices = @transform_0, window_bounds = array<i64: 8, 32>}, {pipeline_mode = #tpu.pipeline_mode<synchronous>, transform_indices = @transform_1, window_bounds = array<i64: 64, 32>}, {pipeline_mode = #tpu.pipeline_mode<synchronous>, transform_indices = @transform_2, window_bounds = array<i64: 64, 1>}, {pipeline_mode = #tpu.pipeline_mode<synchronous>, transform_indices = @transform_3, window_bounds = array<i64: 32, 64>}, {pipeline_mode = #tpu.pipeline_mode<synchronous>, transform_indices = @transform_4, window_bounds = array<i64: 32, 1>}, {pipeline_mode = #tpu.pipeline_mode<synchronous>, transform_indices = @transform_5, window_bounds = array<i64: 1, 32>}, {pipeline_mode = #tpu.pipeline_mode<synchronous>, transform_indices = @transform_6, window_bounds = array<i64: 1, 1>}, {transform_indices = @transform_7, window_bounds = array<i64: 1, 8>}]} {
    %c0 = arith.constant 0 : index
    %c0_0 = arith.constant 0 : index
    %0 = vector.load %arg2[%c0, %c0_0] : memref<64x32xf32, #tpu.memory_space<vmem>>, vector<64x32xf32>
    %c0_1 = arith.constant 0 : index
    %c0_2 = arith.constant 0 : index
    %1 = vector.load %arg1[%c0_1, %c0_2] : memref<8x32xf32, #tpu.memory_space<vmem>>, vector<8x32xf32>
    %cst = arith.constant dense<0.000000e+00> : vector<64x8xf32>
    %2 = tpu.matmul %0, %1, %cst {dimension_numbers = #tpu.dot_dimension_numbers<[1], [1], [0], [0], [0, 0, 1, 0], [], []>} : vector<64x32xf32>, vector<8x32xf32>, vector<64x8xf32> -> vector<64x8xf32>
    %c0_3 = arith.constant 0 : index
    %c0_4 = arith.constant 0 : index
    %3 = vector.load %arg3[%c0_3, %c0_4] : memref<64x1xf32, #tpu.memory_space<vmem>>, vector<64x1xf32>
    %4 = vector.broadcast %3 : vector<64x1xf32> to vector<64x8xf32>
    %5 = arith.addf %2, %4 : vector<64x8xf32>
    %cst_5 = arith.constant 0.000000e+00 : f32
    %6 = vector.broadcast %cst_5 : f32 to vector<64x8xf32>
    %7 = arith.maximumf %5, %6 : vector<64x8xf32>
    %c0_6 = arith.constant 0 : index
    %c0_7 = arith.constant 0 : index
    %8 = vector.load %arg4[%c0_6, %c0_7] : memref<32x64xf32, #tpu.memory_space<vmem>>, vector<32x64xf32>
    %cst_8 = arith.constant dense<0.000000e+00> : vector<32x8xf32>
    %9 = tpu.matmul %8, %7, %cst_8 {dimension_numbers = #tpu.dot_dimension_numbers<[1], [0], [0], [1], [0, 0, 1, 1], [], []>} : vector<32x64xf32>, vector<64x8xf32>, vector<32x8xf32> -> vector<32x8xf32>
    %c0_9 = arith.constant 0 : index
    %c0_10 = arith.constant 0 : index
    %10 = vector.load %arg5[%c0_9, %c0_10] : memref<32x1xf32, #tpu.memory_space<vmem>>, vector<32x1xf32>
    %11 = vector.broadcast %10 : vector<32x1xf32> to vector<32x8xf32>
    %12 = arith.addf %9, %11 : vector<32x8xf32>
    %cst_11 = arith.constant 0.000000e+00 : f32
    %13 = vector.broadcast %cst_11 : f32 to vector<32x8xf32>
    %14 = arith.maximumf %12, %13 : vector<32x8xf32>
    %c0_12 = arith.constant 0 : index
    %c0_13 = arith.constant 0 : index
    %15 = vector.load %arg6[%c0_12, %c0_13] : memref<1x32xf32, #tpu.memory_space<vmem>>, vector<1x32xf32>
    %cst_14 = arith.constant dense<0.000000e+00> : vector<1x8xf32>
    %16 = tpu.matmul %15, %14, %cst_14 {dimension_numbers = #tpu.dot_dimension_numbers<[1], [0], [0], [1], [0, 0, 1, 1], [], []>} : vector<1x32xf32>, vector<32x8xf32>, vector<1x8xf32> -> vector<1x8xf32>
    %c0_15 = arith.constant 0 : index
    %c0_16 = arith.constant 0 : index
    %17 = vector.load %arg7[%c0_15, %c0_16] : memref<1x1xf32, #tpu.memory_space<vmem>>, vector<1x1xf32>
    %18 = vector.broadcast %17 : vector<1x1xf32> to vector<1x8xf32>
    %19 = arith.addf %16, %18 : vector<1x8xf32>
    %c0_17 = arith.constant 0 : index
    %c0_18 = arith.constant 0 : index
    %20 = vector.load %arg8[%c0_17, %c0_18] : memref<1x8xf32, #tpu.memory_space<vmem>>, vector<1x8xf32>
    tpu.vector_store %arg8[%c0_17, %c0_18], %19 {strides = array<i32>} : memref<1x8xf32, #tpu.memory_space<vmem>>, vector<1x8xf32>,
    return
  }
  func.func @transform_0(%arg0: i32) -> (i32, i32) {
    %c0_i32 = arith.constant 0 : i32
    %c0_i32_0 = arith.constant 0 : i32
    return %arg0, %c0_i32 : i32, i32
  }
  func.func @transform_1(%arg0: i32) -> (i32, i32) {
    %c0_i32 = arith.constant 0 : i32
    %c0_i32_0 = arith.constant 0 : i32
    %c0_i32_1 = arith.constant 0 : i32
    return %c0_i32, %c0_i32_0 : i32, i32
  }
  func.func @transform_2(%arg0: i32) -> (i32, i32) {
    %c0_i32 = arith.constant 0 : i32
    %c0_i32_0 = arith.constant 0 : i32
    %c0_i32_1 = arith.constant 0 : i32
    return %c0_i32, %c0_i32_0 : i32, i32
  }
  func.func @transform_3(%arg0: i32) -> (i32, i32) {
    %c0_i32 = arith.constant 0 : i32
    %c0_i32_0 = arith.constant 0 : i32
    %c0_i32_1 = arith.constant 0 : i32
    return %c0_i32, %c0_i32_0 : i32, i32
  }
  func.func @transform_4(%arg0: i32) -> (i32, i32) {
    %c0_i32 = arith.constant 0 : i32
    %c0_i32_0 = arith.constant 0 : i32
    %c0_i32_1 = arith.constant 0 : i32
    return %c0_i32, %c0_i32_0 : i32, i32
  }
  func.func @transform_5(%arg0: i32) -> (i32, i32) {
    %c0_i32 = arith.constant 0 : i32
    %c0_i32_0 = arith.constant 0 : i32
    %c0_i32_1 = arith.constant 0 : i32
    return %c0_i32, %c0_i32_0 : i32, i32
  }
  func.func @transform_6(%arg0: i32) -> (i32, i32) {
    %c0_i32 = arith.constant 0 : i32
    %c0_i32_0 = arith.constant 0 : i32
    %c0_i32_1 = arith.constant 0 : i32
    return %c0_i32, %c0_i32_0 : i32, i32
  }
  func.func @transform_7(%arg0: i32) -> (i32, i32) {
    %c0_i32 = arith.constant 0 : i32
    %c0_i32_0 = arith.constant 0 : i32
    return %c0_i32, %arg0 : i32, i32
  }
}

</mosaic_0001>

<bundles_post_ra>
// kernel: tpu_custom_call.1
= control target key start
LH: loop header
LB: loop body
LE: loop exit
PB: predicated region body
PF: predicated region fallthrough
CT: control target
= control target key end

     0   :  { %s477_s0 = inlined_call_operand.vmem [shape: f32[8,32], index: 0, kind: input, shape index: {}]   ;;  %s478_s1 = inlined_call_operand.vmem [shape: f32[64,32], index: 1, kind: input, shape index: {}]   ;;  %s479_s2 = inlined_call_operand.vmem [shape: f32[64,1], index: 2, kind: input, shape index: {}]   ;;  %s480_s3 = inlined_call_operand.vmem [shape: f32[32,64], index: 3, kind: input, shape index: {}]   ;;  %s481_s4 = inlined_call_operand.vmem [shape: f32[32,1], index: 4, kind: input, shape index: {}]   ;;  %s482_s5 = inlined_call_operand.vmem [shape: f32[1,32], index: 5, kind: input, shape index: {}]   ;;  %s483_s6 = inlined_call_operand.<no memory space> [shape: f32[1,1], index: 6, kind: input, shape index: {}]   ;;  %s484_s7 = inlined_call_operand.hbm [shape: f32[1,8], index: 7, kind: output, shape index: {}]  }
   0x1   :  { %v12_v0 = vstv %s483_s6 }
   0x2   :  { %13 = vst [vmem:[#allocation2] sm:$0x1] %v12_v0 }
   0x3   :  { %v37_v1 = vld [vmem:[%s477_s0] sm:$0xff]  ;;  %vm86_vm0 = vcmask 261120   ;;  %v45_v2 = vld [vmem:[%s479_s2 + $0x38] sm:$0xff]  ;;  %v340_v4 = vmov 0   ;;  %v43_v5 = vld [vmem:[%s479_s2 + $0x28] sm:$0xff] }
   0x4   :  { %300 = vmatpush.xpose.msk.msra.mxu3 %vm86_vm0, %v37_v1  ;;  %v33_v3 = vld [vmem:[%s478_s1 + $0x20] sm:$0xff]  ;;  %311 = vset.pattern.permute.xlu0 %v340_v4  ;;  %v41_v7 = vld [vmem:[%s479_s2 + $0x18] sm:$0xff]  ;;  %v44_v8 = vld [vmem:[%s479_s2 + $0x30] sm:$0xff] }
   0x5   :  { %83 = vperm.xlu0 %311, %v45_v2   ;;  %286 = vmatpush.xpose.msk.msra.mxu0 %vm86_vm0, %v37_v1  ;;  %v29_v6 = vld [vmem:[%s478_s1] sm:$0xff] }
   0x6   :  { %312 = vset.pattern.permute.xlu1 %v340_v4  ;;  %313 = vset.pattern.permute.xlu2 %v340_v4 }
   0x7   :  { %291 = vmatmul.msk.f32.vlgmr.msra.gmra.mxu3 %vm86_vm0, %v33_v3  ;;  %73 = vperm.xlu1 %312, %v43_v5  }
   0x8   :  { %287 = vmatmul.msk.f32.vlgmr.msra.gmra.mxu0 %vm86_vm0, %v29_v6  ;;  %63 = vperm.xlu2 %313, %v41_v7  }
   0x9   :  { %14 = vsyncpa [#allocation4], 0  ;;  %v34_v9 = vld [vmem:[%s478_s1 + $0x28] sm:$0xff]  ;;  %v42_v10 = vld [vmem:[%s479_s2 + $0x20] sm:$0xff]  ;;  %vm191_vm1 = vcmask 523264   ;;  %s341_s24 = smov [#allocation3]  }
   0xa   :  { %v30_v11 = vld [vmem:[%s478_s1 + $0x8] sm:$0xff]  ;;  %v40_v12 = vld [vmem:[%s479_s2 + $0x10] sm:$0xff]  ;;  %v38_v15 = vld [vmem:[%s479_s2] sm:$0xff]  ;;  %s275_s25 = sshll.u32 %s341_s24, 4  ;;  %s277_s28 = sshll.u32 %s484_s7, 4  ;;  %vm268_vm2 = vcmask 57344   ;;  %s276_s25 = int_to_ptr.vmem [resolvable:$true] %s275_s25  ;;  %s278_s28 = int_to_ptr.hbm [resolvable:$true] %s277_s28 }
   0xb   :  { %v39_v13 = vld [vmem:[%s479_s2 + $0x8] sm:$0xff]  ;;  %v35_v14 = vld [vmem:[%s478_s1 + $0x30] sm:$0xff]  ;;  %v170_v17 = vld [vmem:[%s481_s4 + $0x18] sm:$0xff] }
   0xc   :  { %v31_v16 = vld [vmem:[%s478_s1 + $0x10] sm:$0xff]  ;;  %v36_v19 = vld [vmem:[%s478_s1 + $0x38] sm:$0xff]  ;;  %v168_v20 = vld [vmem:[%s481_s4 + $0x8] sm:$0xff] }
   0xd   :  { %78 = vperm.xlu0 %311, %v44_v8   ;;  %v169_v18 = vld [vmem:[%s481_s4 + $0x10] sm:$0xff]  ;;  %v32_v21 = vld [vmem:[%s478_s1 + $0x18] sm:$0xff]  ;;  %v167_v22 = vld [vmem:[%s481_s4] sm:$0xff] }
   0xe   :  { %v238_v23 = vld [vmem:[#allocation2] sm:$0x1]  ;;  %v166_v57 = vld [vmem:[%s480_s3 + $0x18] sm:$0xff]  ;;  %v164_v58 = vld [vmem:[%s480_s3 + $0x8] sm:$0xff] }
   0xf   :  { %292 = vmatmul.msk.f32.gmra.mxu3 %vm86_vm0, %v34_v9  ;;  %68 = vperm.xlu1 %312, %v42_v10   ;;  %v163_v56 = vld [vmem:[%s480_s3] sm:$0xff]  ;;  %v165_v59 = vld [vmem:[%s480_s3 + $0x10] sm:$0xff] }
  0x10   :  { %288 = vmatmul.msk.f32.gmra.mxu0 %vm86_vm0, %v30_v11  ;;  %58 = vperm.xlu2 %313, %v40_v12   ;;  %v237_v12 = vld [vmem:[%s482_s5] sm:$0x1] }
  0x15   :  { %53 = vperm.xlu0 %311, %v39_v13  }
  0x17   :  { %293 = vmatmul.msk.f32.gmra.mxu3 %vm86_vm0, %v35_v14  ;;  %48 = vperm.xlu1 %312, %v38_v15  }
  0x18   :  { %289 = vmatmul.msk.f32.gmra.mxu0 %vm86_vm0, %v31_v16  ;;  %188 = vperm.xlu2 %313, %v170_v17  }
  0x1d   :  { %183 = vperm.xlu0 %311, %v169_v18  }
  0x1f   :  { %294 = vmatmul.msk.f32.gmra.mxu3 %vm86_vm0, %v36_v19  ;;  %178 = vperm.xlu1 %312, %v168_v20  }
  0x20   :  { %290 = vmatmul.msk.f32.gmra.mxu0 %vm86_vm0, %v32_v21  ;;  %173 = vperm.xlu2 %313, %v167_v22  }
  0x25   :  { %241 = vperm.xlu0 %311, %v238_v23  }
  0x62   :  { %v64_v32 = vpop.permute.xlu2 %63 }
  0x6a   :  { %v59_v45 = vpop.permute.xlu2 %58 }
  0x72   :  { %v189_v61 = vpop.permute.xlu2 %188 }
  0x77   :  { %v84_v28 = vpop.permute.xlu0 %83 }
  0x79   :  { %v74_v29 = vpop.permute.xlu1 %73 }
  0x7a   :  { %v174_v7 = vpop.permute.xlu2 %173 }
  0x7f   :  { %v79_v33 = vpop.permute.xlu0 %78 }
  0x81   :  { %v69_v34 = vpop.permute.xlu1 %68 }
  0x85   :  { %v131_v24 = vpop.f32.mrf.mxu0 }
  0x87   :  { %v54_v48 = vpop.permute.xlu0 %53 }
  0x89   :  { %v49_v49 = vpop.permute.xlu1 %48 }
  0x8a   :  { %v143_v25 = vpop.f32.mrf.mxu3  ;;  %v132_v52 = vadd.f32 %v131_v24, %v49_v49 }
  0x8b   :  { %v144_v41 = vadd.f32 %v143_v25, %v69_v34 }
  0x8c   :  { %v155_v55 = vmax.f32 %v132_v52, 0.0 }
  0x8d   :  { %v134_v27 = vpop.f32.mrf.mxu0  ;;  %v159_v46 = vmax.f32 %v144_v41, 0.0 }
  0x8e   :  { %v135_v50 = vadd.f32 %v134_v27, %v54_v48 }
  0x8f   :  { %v184_v2 = vpop.permute.xlu0 %183 }
  0x90   :  { %v156_v54 = vmax.f32 %v135_v50, 0.0 }
  0x91   :  { %v179_v3 = vpop.permute.xlu1 %178 }
  0x92   :  { %v146_v26 = vpop.f32.mrf.mxu3 }
  0x93   :  { %v147_v38 = vadd.f32 %v146_v26, %v74_v29 }
  0x95   :  { %v137_v31 = vpop.f32.mrf.mxu0  ;;  %v160_v43 = vmax.f32 %v147_v38, 0.0 }
  0x96   :  { %v138_v47 = vadd.f32 %v137_v31, %v59_v45 }
  0x97   :  { %v242_v13 = vpop.permute.xlu0 %241 }
  0x98   :  { %v157_v53 = vmax.f32 %v138_v47, 0.0  ;;  %v244_v14 = vperm.slane %v242_v13, 0 }
  0x9a   :  { %v149_v30 = vpop.f32.mrf.mxu3 }
  0x9b   :  { %v150_v36 = vadd.f32 %v149_v30, %v79_v33 }
  0x9d   :  { %v140_v40 = vpop.f32.mrf.mxu0  ;;  %v161_v42 = vmax.f32 %v150_v36, 0.0 }
  0x9e   :  { %v141_v44 = vadd.f32 %v140_v40, %v64_v32 }
  0xa0   :  { %v158_v51 = vmax.f32 %v141_v44, 0.0 }
  0xa2   :  { %v152_v35 = vpop.f32.mrf.mxu3 }
  0xa3   :  { %v153_v37 = vadd.f32 %v152_v35, %v84_v28 }
  0xa5   :  { %v162_v39 = vmax.f32 %v153_v37, 0.0 }
  0xa7   :  { %212 = vmatpush.msra.mxu1 %v162_v39  ;;  %301 = vmatpush.msra.mxu2 %v162_v39 }
  0xa9   :  { %213 = vmatpush.msra.mxu1 %v161_v42  ;;  %302 = vmatpush.msra.mxu2 %v161_v42 }
  0xab   :  { %214 = vmatpush.msra.mxu1 %v160_v43  ;;  %303 = vmatpush.msra.mxu2 %v160_v43 }
  0xad   :  { %215 = vmatpush.msra.mxu1 %v159_v46  ;;  %304 = vmatpush.msra.mxu2 %v159_v46 }
  0xaf   :  { %216 = vmatpush.msra.mxu1 %v158_v51  ;;  %305 = vmatpush.msra.mxu2 %v158_v51 }
  0xb1   :  { %217 = vmatpush.msra.mxu1 %v157_v53  ;;  %306 = vmatpush.msra.mxu2 %v157_v53 }
  0xb3   :  { %218 = vmatpush.msra.mxu1 %v156_v54  ;;  %307 = vmatpush.msra.mxu2 %v156_v54 }
  0xb5   :  { %219 = vmatpush.msra.mxu1 %v155_v55  ;;  %308 = vmatpush.msra.mxu2 %v155_v55 }
  0xb6   :  { %295 = vmatmul.msk.f32.vlgmr.msra.gmra.mxu1 %vm191_vm1, %v163_v56  ;;  %298 = vmatmul.msk.f32.vlgmr.msra.gmra.mxu2 %vm191_vm1, %v166_v57 }
  0xbe   :  { %296 = vmatmul.msk.f32.gmra.mxu1 %vm191_vm1, %v164_v58 }
  0xc6   :  { %297 = vmatmul.msk.f32.gmra.mxu1 %vm191_vm1, %v165_v59 }
 0x133   :  { %v221_v60 = vpop.f32.mrf.mxu1 }
 0x134   :  { %v222_v8 = vadd.f32 %v221_v60, %v174_v7 }
 0x136   :  { %v233_v11 = vmax.f32 %v222_v8, 0.0 }
 0x139   :  { %v230_v62 = vpop.f32.mrf.mxu2 }
 0x13a   :  { %v231_v63 = vadd.f32 %v230_v62, %v189_v61 }
 0x13b   :  { %v224_v0 = vpop.f32.mrf.mxu1 }
 0x13c   :  { %v236_v1 = vmax.f32 %v231_v63, 0.0  ;;  %v225_v5 = vadd.f32 %v224_v0, %v179_v3 }
 0x13e   :  { %260 = vmatpush.msrb.mxu2 %v236_v1  ;;  %v234_v10 = vmax.f32 %v225_v5, 0.0 }
 0x143   :  { %v227_v4 = vpop.f32.mrf.mxu1 }
 0x144   :  { %v228_v6 = vadd.f32 %v227_v4, %v184_v2 }
 0x146   :  { %v235_v9 = vmax.f32 %v228_v6, 0.0 }
 0x148   :  { %261 = vmatpush.msrb.mxu2 %v235_v9 }
 0x14a   :  { %262 = vmatpush.msrb.mxu2 %v234_v10 }
 0x14c   :  { %263 = vmatpush.msrb.mxu2 %v233_v11 }
 0x14d   :  { %299 = vmatmul.msk.f32.vlgmr.msrb.gmra.mxu2 %vm86_vm0, %v237_v12 }
 0x1d0   :  { %v265_v15 = vpop.f32.mrf.mxu2 }
 0x1d1   :  { %v266_v16 = vadd.f32 %v265_v15, %v244_v14 }
 0x1d3   :  { %269 = vst.msk [vmem:[#allocation3] sm:$0x1] %vm268_vm2, %v266_v16 }
 0x1d4   :  { %280 = dma.vmem_to_hbm [thread:$0]  %s276_s25, 16, %s278_s28, [#allocation4]  }
 0x1d5   :  { %338 = dma.done.wait [#allocation4], 16  }
 0x1d6   :  { %339 = vsyncadd [#allocation4], 4294967280 }
 0x1d7   :  { %285 = vsyncpa [#allocation4], 1 }

</bundles_post_ra>
